<compile_context>
chip_gen: v7x
topology: tpu7x:2x2x1
jax: 0.10.0
libtpu: 0.0.40
codegen_flags: <defaults>
</compile_context>

<pallas_src>
import jax
import jax.numpy as jnp
from jax.experimental import pallas as pl
from jax.experimental.pallas import tpu as pltpu


def _round_up(x: int, m: int) -> int:
    return ((x + m - 1) // m) * m


def _choose_batch_tile(B: int, tile_b: int) -> int:
    """Pick a batch tile (multiple of 8) that minimizes batch padding."""
    B8 = _round_up(B, 8)
    if B8 <= tile_b:
        return B8                      # single grid step, zero/near-zero padding
    candidates = [c for c in (512, 256, 128) if c <= tile_b] or [_round_up(tile_b, 8)]
    # minimize padded rows; prefer the larger tile on ties (fewer grid steps)
    return min(candidates, key=lambda c: (_round_up(B, c) - B, -c))


def fd_kernel(x_ref, w1_ref, b1_ref, w2_ref, b2_ref, o_ref):
    # fc1: (TB, in_dim) @ (in_dim, H) + (1, H)
    h = jnp.dot(x_ref[...], w1_ref[...], preferred_element_type=jnp.float32)
    h = h + b1_ref[...]
    # F.leaky_relu default negative_slope = 0.01
    h = jnp.where(h > 0, h, 0.01 * h)
    # fc2: (TB, H) @ (H, out_dim) + (1, out_dim)
    o = jnp.dot(h, w2_ref[...], preferred_element_type=jnp.float32)
    o = o + b2_ref[...]
    o_ref[...] = o.astype(o_ref.dtype)


def prepare_fd_params(w1, b1, w2, b2):
    """One-time parameter prep (hoisted out of the per-call path).

    Weights are kept at their native shapes (full-dim blocks are legal), only
    the biases are reshaped to 2-D rows for in-kernel broadcasting.
    """
    return w1, b1.reshape(1, -1), w2, b2.reshape(1, -1)


def fd_forward(x, params, *, tile_b: int = 512):
    """x: (B, in_dim); params: output of prepare_fd_params."""
    w1, b1, w2, b2 = params
    B, in_dim = x.shape
    H = w1.shape[1]
    out_dim = w2.shape[1]
    dtype = x.dtype

    # ---- batch tiling (only the batch dim is ever padded) ------------------
    tb = _choose_batch_tile(B, tile_b)
    Bp = _round_up(B, tb)
    x_p = x if Bp == B else jnp.pad(x, ((0, Bp - B), (0, 0)))

    grid = (Bp // tb,)

    # Advisory cost estimate reflecting the ACTUAL HBM traffic of the kernel.
    cost = pl.CostEstimate(
        flops=2 * Bp * (in_dim * H + H * out_dim),
        transcendentals=0,
        bytes_accessed=4 * (Bp * in_dim + in_dim * H + H
                            + H * out_dim + out_dim + Bp * out_dim),
    )

    y_p = pl.pallas_call(
        fd_kernel,
        out_shape=jax.ShapeDtypeStruct((Bp, out_dim), dtype),
        grid_spec=pltpu.PrefetchScalarGridSpec(
            num_scalar_prefetch=0,
            grid=grid,
            in_specs=[
                # x: batch-tiled; last dim equals full array width (legal).
                pl.BlockSpec((tb, in_dim), lambda i: (i, 0)),
                # weights/biases: full arrays, VMEM-resident across the grid.
                pl.BlockSpec((in_dim, H), lambda i: (0, 0)),
                pl.BlockSpec((1, H), lambda i: (0, 0)),
                pl.BlockSpec((H, out_dim), lambda i: (0, 0)),
                pl.BlockSpec((1, out_dim), lambda i: (0, 0)),
            ],
            # output at its true width; batch-tiled.
            out_specs=pl.BlockSpec((tb, out_dim), lambda i: (i, 0)),
        ),
        compiler_params=pltpu.CompilerParams(
            # Batch tiles are independent -> shardable across v7x's 2 TCs.
            # TODO(synk): verify in xprof that both TCs get work on v7x; if
            # not, switch to pltpu.CORE_PARALLEL.
            dimension_semantics=("parallel",),
        ),
        cost_estimate=cost,
    )(x_p, w1, b1, w2, b2)

    # Strip batch padding back to the logical shape (no lane slicing needed).
    return y_p if Bp == B else y_p[:B]


def init_fd_params(key, in_dim=16, H=256, out_dim=10, dtype=jnp.float32):
    """Deterministic init mimicking nn.Linear's U(-1/sqrt(fan_in), 1/sqrt(fan_in))."""
    k1, k2, k3, k4 = jax.random.split(key, 4)
    lim1 = 1.0 / jnp.sqrt(jnp.float32(in_dim))
    lim2 = 1.0 / jnp.sqrt(jnp.float32(H))
    # Stored as (in_features, out_features) == PyTorch weight.T
    w1 = jax.random.uniform(k1, (in_dim, H), dtype, -lim1, lim1)
    b1 = jax.random.uniform(k2, (H,), dtype, -lim1, lim1)
    w2 = jax.random.uniform(k3, (H, out_dim), dtype, -lim2, lim2)
    b2 = jax.random.uniform(k4, (out_dim,), dtype, -lim2, lim2)
    return w1, b1, w2, b2


if __name__ == "__main__":
    key = jax.random.PRNGKey(0)
    kx, kp = jax.random.split(key)

    B, in_dim, H, out_dim = 8, 16, 256, 10
    x = jax.random.normal(kx, (B, in_dim), jnp.float32)
    w1, b1, w2, b2 = init_fd_params(kp, in_dim=in_dim, H=H, out_dim=out_dim)

    # One-time parameter preparation (hoisted out of the forward pass).
    params = prepare_fd_params(w1, b1, w2, b2)

    y = fd_forward(x, params)
    y = jax.block_until_ready(y)

    # Pure-JAX reference of the same forward pass (fin_act=None -> identity).
    h_ref = x @ w1 + b1
    h_ref = jnp.where(h_ref > 0, h_ref, 0.01 * h_ref)
    y_ref = h_ref @ w2 + b2
    assert y.shape == (B, out_dim)
    assert jnp.allclose(y, y_ref, atol=1e-4, rtol=1e-4)

    print("KERNEL_OK")
</pallas_src>

<mosaic_0001>
module attributes {stable_mosaic.version = 11 : i64} {
  func.func @fd_kernel(%arg0: i32, %arg1: memref<8x16xf32, #tpu.memory_space<vmem>>, %arg2: memref<16x256xf32, #tpu.memory_space<vmem>>, %arg3: memref<1x256xf32, #tpu.memory_space<vmem>>, %arg4: memref<256x10xf32, #tpu.memory_space<vmem>>, %arg5: memref<1x10xf32, #tpu.memory_space<vmem>>, %arg6: memref<8x10xf32, #tpu.memory_space<vmem>>) attributes {dimension_semantics = [#tpu.dimension_semantics<parallel>], iteration_bounds = array<i64: 1>, scalar_prefetch = 0 : i64, scratch_operands = 0 : i64, tpu.core_type = #tpu.core_type<tc>, window_params = [{transform_indices = @transform_0, window_bounds = array<i64: 8, 16>}, {pipeline_mode = #tpu.pipeline_mode<synchronous>, transform_indices = @transform_1, window_bounds = array<i64: 16, 256>}, {pipeline_mode = #tpu.pipeline_mode<synchronous>, transform_indices = @transform_2, window_bounds = array<i64: 1, 256>}, {pipeline_mode = #tpu.pipeline_mode<synchronous>, transform_indices = @transform_3, window_bounds = array<i64: 256, 10>}, {pipeline_mode = #tpu.pipeline_mode<synchronous>, transform_indices = @transform_4, window_bounds = array<i64: 1, 10>}, {transform_indices = @transform_5, window_bounds = array<i64: 8, 10>}]} {
    %c0 = arith.constant 0 : index
    %c0_0 = arith.constant 0 : index
    %0 = vector.load %arg1[%c0, %c0_0] : memref<8x16xf32, #tpu.memory_space<vmem>>, vector<8x16xf32>
    %c0_1 = arith.constant 0 : index
    %c0_2 = arith.constant 0 : index
    %1 = vector.load %arg2[%c0_1, %c0_2] : memref<16x256xf32, #tpu.memory_space<vmem>>, vector<16x256xf32>
    %cst = arith.constant dense<0.000000e+00> : vector<8x256xf32>
    %2 = tpu.matmul %0, %1, %cst {dimension_numbers = #tpu.dot_dimension_numbers<[1], [0], [0], [1], [0, 0, 1, 1], [], []>} : vector<8x16xf32>, vector<16x256xf32>, vector<8x256xf32> -> vector<8x256xf32>
    %c0_3 = arith.constant 0 : index
    %c0_4 = arith.constant 0 : index
    %3 = vector.load %arg3[%c0_3, %c0_4] : memref<1x256xf32, #tpu.memory_space<vmem>>, vector<1x256xf32>
    %4 = vector.broadcast %3 : vector<1x256xf32> to vector<8x256xf32>
    %5 = arith.addf %2, %4 : vector<8x256xf32>
    %cst_5 = arith.constant 0.000000e+00 : f32
    %6 = vector.broadcast %cst_5 : f32 to vector<8x256xf32>
    %7 = arith.cmpf ogt, %5, %6 : vector<8x256xf32>
    %cst_6 = arith.constant 0.00999999977 : f32
    %8 = vector.broadcast %cst_6 : f32 to vector<8x256xf32>
    %9 = arith.mulf %8, %5 : vector<8x256xf32>
    %10 = arith.select %7, %5, %9 : vector<8x256xi1>, vector<8x256xf32>
    %c0_7 = arith.constant 0 : index
    %c0_8 = arith.constant 0 : index
    %11 = vector.load %arg4[%c0_7, %c0_8] : memref<256x10xf32, #tpu.memory_space<vmem>>, vector<256x10xf32>
    %cst_9 = arith.constant dense<0.000000e+00> : vector<8x10xf32>
    %12 = tpu.matmul %10, %11, %cst_9 {dimension_numbers = #tpu.dot_dimension_numbers<[1], [0], [0], [1], [0, 0, 1, 1], [], []>} : vector<8x256xf32>, vector<256x10xf32>, vector<8x10xf32> -> vector<8x10xf32>
    %c0_10 = arith.constant 0 : index
    %c0_11 = arith.constant 0 : index
    %13 = vector.load %arg5[%c0_10, %c0_11] : memref<1x10xf32, #tpu.memory_space<vmem>>, vector<1x10xf32>
    %14 = vector.broadcast %13 : vector<1x10xf32> to vector<8x10xf32>
    %15 = arith.addf %12, %14 : vector<8x10xf32>
    %c0_12 = arith.constant 0 : index
    %c0_13 = arith.constant 0 : index
    %16 = vector.load %arg6[%c0_12, %c0_13] : memref<8x10xf32, #tpu.memory_space<vmem>>, vector<8x10xf32>
    tpu.vector_store %arg6[%c0_12, %c0_13], %15 {strides = array<i32>} : memref<8x10xf32, #tpu.memory_space<vmem>>, vector<8x10xf32>,
    return
  }
  func.func @transform_0(%arg0: i32) -> (i32, i32) {
    %c0_i32 = arith.constant 0 : i32
    %c0_i32_0 = arith.constant 0 : i32
    return %arg0, %c0_i32 : i32, i32
  }
  func.func @transform_1(%arg0: i32) -> (i32, i32) {
    %c0_i32 = arith.constant 0 : i32
    %c0_i32_0 = arith.constant 0 : i32
    %c0_i32_1 = arith.constant 0 : i32
    return %c0_i32, %c0_i32_0 : i32, i32
  }
  func.func @transform_2(%arg0: i32) -> (i32, i32) {
    %c0_i32 = arith.constant 0 : i32
    %c0_i32_0 = arith.constant 0 : i32
    %c0_i32_1 = arith.constant 0 : i32
    return %c0_i32, %c0_i32_0 : i32, i32
  }
  func.func @transform_3(%arg0: i32) -> (i32, i32) {
    %c0_i32 = arith.constant 0 : i32
    %c0_i32_0 = arith.constant 0 : i32
    %c0_i32_1 = arith.constant 0 : i32
    return %c0_i32, %c0_i32_0 : i32, i32
  }
  func.func @transform_4(%arg0: i32) -> (i32, i32) {
    %c0_i32 = arith.constant 0 : i32
    %c0_i32_0 = arith.constant 0 : i32
    %c0_i32_1 = arith.constant 0 : i32
    return %c0_i32, %c0_i32_0 : i32, i32
  }
  func.func @transform_5(%arg0: i32) -> (i32, i32) {
    %c0_i32 = arith.constant 0 : i32
    %c0_i32_0 = arith.constant 0 : i32
    return %arg0, %c0_i32 : i32, i32
  }
}

</mosaic_0001>

<bundles_post_ra>
// kernel: tpu_custom_call.1
= control target key start
LH: loop header
LB: loop body
LE: loop exit
PB: predicated region body
PF: predicated region fallthrough
CT: control target
= control target key end

     0   :  { %v343_v5 = vmov 0.0   ;;  %vm38_vm0 = vcmask 130048   ;;  %s504_s0 = inlined_call_operand.vmem [shape: f32[8,16], index: 0, kind: input, shape index: {}]   ;;  %s505_s1 = inlined_call_operand.vmem [shape: f32[16,256], index: 1, kind: input, shape index: {}]   ;;  %s506_s2 = inlined_call_operand.vmem [shape: f32[1,256], index: 2, kind: input, shape index: {}]   ;;  %s507_s3 = inlined_call_operand.vmem [shape: f32[256,10], index: 3, kind: input, shape index: {}]   ;;  %s508_s4 = inlined_call_operand.vmem [shape: f32[1,10], index: 4, kind: input, shape index: {}]   ;;  %s509_s5 = inlined_call_operand.hbm [shape: f32[8,10], index: 5, kind: output, shape index: {}]  }
   0x1   :  { %v23_v0 = vld [vmem:[%s505_s1 + $0x8] sm:$0xff]  ;;  %v25_v1 = vld [vmem:[%s505_s1 + $0x18] sm:$0xff]  ;;  %v22_v2 = vld [vmem:[%s505_s1] sm:$0xff]  ;;  %106 = vmatprep.mubr.f32.mxu0 %v343_v5 }
   0x2   :  { %v281_v3 = vpack.c.bf16 %v25_v1, %v23_v0  ;;  %v24_v4 = vld [vmem:[%s505_s1 + $0x10] sm:$0xff]  ;;  %v135_v6 = vld [vmem:[%s507_s3 + $0x80] sm:$0xff]  ;;  %v136_v9 = vld [vmem:[%s507_s3 + $0x88] sm:$0xff] }
   0x3   :  { %v283_v7 = vpack.c.bf16 %v24_v4, %v22_v2  ;;  %v21_v8 = vld [vmem:[%s504_s0] sm:$0xff]  ;;  %v120_v11 = vld [vmem:[%s507_s3 + $0x8] sm:$0xff]  ;;  %v285_v12 = vpack.c.bf16 %v136_v9, %v135_v6  ;;  %v137_v14 = vld [vmem:[%s507_s3 + $0x90] sm:$0xff] }
   0x4   :  { %v119_v10 = vld [vmem:[%s507_s3] sm:$0xff]  ;;  %282 = vmatprep.subr.bf16.mxu0 %v281_v3  ;;  %v138_v15 = vld [vmem:[%s507_s3 + $0x98] sm:$0xff]  ;;  %v121_v16 = vld [vmem:[%s507_s3 + $0x10] sm:$0xff] }
   0x5   :  { %v287_v13 = vpack.c.bf16 %v120_v11, %v119_v10  ;;  %284 = vmatpush1.bf16.msra.mxu0 %v283_v7  ;;  %v289_v17 = vpack.c.bf16 %v138_v15, %v137_v14  ;;  %v122_v18 = vld [vmem:[%s507_s3 + $0x18] sm:$0xff]  ;;  %v139_v19 = vld [vmem:[%s507_s3 + $0xa0] sm:$0xff]  ;;  %v140_v20 = vld [vmem:[%s507_s3 + $0xa8] sm:$0xff]  ;;  %286 = vmatprep.subr.bf16.mxu1 %v285_v12 }
   0x6   :  { %v291_v21 = vpack.c.bf16 %v122_v18, %v121_v16  ;;  %v293_v22 = vpack.c.bf16 %v140_v20, %v139_v19  ;;  %v123_v23 = vld [vmem:[%s507_s3 + $0x20] sm:$0xff]  ;;  %v124_v24 = vld [vmem:[%s507_s3 + $0x28] sm:$0xff]  ;;  %v141_v25 = vld [vmem:[%s507_s3 + $0xb0] sm:$0xff] }
   0x7   :  { %288 = vmatpush3.bf16.msra.mxu1 %v287_v13  ;;  %v142_v26 = vld [vmem:[%s507_s3 + $0xb8] sm:$0xff]  ;;  %v295_v27 = vpack.c.bf16 %v124_v24, %v123_v23 }
   0x8   :  { %244 = vmatmul.mubr.msk.f32.vlgmr.msra.gmra.mrb[0].mxu0 %vm38_vm0, %v21_v8  ;;  %290 = vmatprep.subr.bf16.mxu1 %v289_v17 }
   0xb   :  { %292 = vmatpush3.bf16.msra.mxu1 %v291_v21 }
   0xc   :  { %10 = vsyncpa [#allocation3], 0  ;;  %294 = vmatprep.subr.bf16.mxu1 %v293_v22  ;;  %v297_v28 = vpack.c.bf16 %v142_v26, %v141_v25  ;;  %v125_v29 = vld [vmem:[%s507_s3 + $0x30] sm:$0xff]  ;;  %v126_v30 = vld [vmem:[%s507_s3 + $0x38] sm:$0xff]  ;;  %v28_v56 = vlaneseq  ;;  %vm228_vm3 = vcmask 80896  }
   0xd   :  { %v143_v31 = vld [vmem:[%s507_s3 + $0xc0] sm:$0xff]  ;;  %v144_v32 = vld [vmem:[%s507_s3 + $0xc8] sm:$0xff]  ;;  %v299_v33 = vpack.c.bf16 %v126_v30, %v125_v29  ;;  %v145_v37 = vld [vmem:[%s507_s3 + $0xd0] sm:$0xff] }
   0xe   :  { %v301_v34 = vpack.c.bf16 %v144_v32, %v143_v31  ;;  %v127_v35 = vld [vmem:[%s507_s3 + $0x40] sm:$0xff]  ;;  %v128_v36 = vld [vmem:[%s507_s3 + $0x48] sm:$0xff]  ;;  %v146_v38 = vld [vmem:[%s507_s3 + $0xd8] sm:$0xff]  ;;  %v29_v57 = vshrl.u32 %v28_v56, 7 }
   0xf   :  { %296 = vmatpush3.bf16.msra.mxu1 %v295_v27  ;;  %v303_v39 = vpack.c.bf16 %v128_v36, %v127_v35  ;;  %v305_v40 = vpack.c.bf16 %v146_v38, %v145_v37  ;;  %v129_v41 = vld [vmem:[%s507_s3 + $0x50] sm:$0xff]  ;;  %v130_v42 = vld [vmem:[%s507_s3 + $0x58] sm:$0xff]  ;;  %v147_v44 = vld [vmem:[%s507_s3 + $0xe0] sm:$0xff] }
  0x10   :  { %298 = vmatprep.subr.bf16.mxu1 %v297_v28  ;;  %v307_v43 = vpack.c.bf16 %v130_v42, %v129_v41  ;;  %v148_v45 = vld [vmem:[%s507_s3 + $0xe8] sm:$0xff]  ;;  %v131_v47 = vld [vmem:[%s507_s3 + $0x60] sm:$0xff]  ;;  %v149_v50 = vld [vmem:[%s507_s3 + $0xf0] sm:$0xff]  ;;  %v30_v58 = vsub.s32 0, %v29_v57  ;;  %v34_v60 = vsub.s32 1, %v29_v57 }
  0x11   :  { %v309_v46 = vpack.c.bf16 %v148_v45, %v147_v44  ;;  %v132_v48 = vld [vmem:[%s507_s3 + $0x68] sm:$0xff]  ;;  %v150_v51 = vld [vmem:[%s507_s3 + $0xf8] sm:$0xff]  ;;  %v133_v53 = vld [vmem:[%s507_s3 + $0x70] sm:$0xff] }
  0x12   :  { %v311_v49 = vpack.c.bf16 %v132_v48, %v131_v47  ;;  %v313_v52 = vpack.c.bf16 %v150_v51, %v149_v50  ;;  %v134_v54 = vld [vmem:[%s507_s3 + $0x78] sm:$0xff]  ;;  %v26_v59 = vld [vmem:[%s506_s2] sm:$0x3]  ;;  %s344_s2 = smov [#allocation2]  }
  0x13   :  { %300 = vmatpush3.bf16.msra.mxu1 %v299_v33  ;;  %v315_v55 = vpack.c.bf16 %v134_v54, %v133_v53  ;;  %v31_v61 = vrot.slane %v26_v59, %v30_v58  ;;  %v35_v62 = vrot.slane %v26_v59, %v34_v60  ;;  %v245_v8 = vld [vmem:[%s508_s4] ss:$0 sm:$0xff]  ;;  %s236_s14 = sshll.u32 %s344_s2, 4  ;;  %s237_s14 = int_to_ptr.vmem [resolvable:$true] %s236_s14 }
  0x14   :  { %302 = vmatprep.subr.bf16.mxu1 %v301_v34  ;;  %s319_s15 = scalar_lea.vmem %s237_s14, 128  ;;  %p324_p1 = scmp.lt.s32.totalorder %s237_s14, %s237_s14 }
  0x15   :  { %p320_p0 = scmp.ne.s32.totalorder %s237_s14, %s319_s15  ;;  %p325_p2 = scmp.lt.s32.totalorder %s319_s15, %s319_s15 }
  0x17   :  { %304 = vmatpush3.bf16.msra.mxu1 %v303_v39  ;;  %p326_p3 = por %p325_p2, %p324_p1 }
  0x18   :  { %306 = vmatprep.subr.bf16.mxu1 %v305_v40 }
  0x19   :  { %p327_p4 = pnand %p326_p3, %p320_p0 }
  0x1b   :  { %308 = vmatpush3.bf16.msra.mxu1 %v307_v43 }
  0x1c   :  { %310 = vmatprep.subr.bf16.mxu1 %v309_v46 }
  0x1f   :  { %312 = vmatpush3.bf16.msra.mxu1 %v311_v49 }
  0x20   :  { %314 = vmatprep.subr.bf16.mxu1 %v313_v52 }
  0x23   :  { %316 = vmatpush3.bf16.msra.mxu1 %v315_v55 }
  0xdb   :  { %v108_v63 = vpop.f32.mrb[0].mxu0 }
  0xdc   :  { %v109_v0 = vadd.f32 %v108_v63, %v31_v61  ;;  %v110_v1 = vpop.f32.mrb[1].mxu0 }
  0xdd   :  { %v111_v2 = vadd.f32 %v110_v1, %v35_v62 }
  0xde   :  { %v115_v3 = vmul.f32 0.01, %v109_v0  ;;  %vm113_vm2 = vcmp.gt.f32.partialorder %v109_v0, 0.0 }
  0xdf   :  { %vm114_vm1 = vcmp.gt.f32.partialorder %v111_v2, 0.0  ;;  %v116_v4 = vmul.f32 0.01, %v111_v2 }
  0xe0   :  { %v117_v6 = vsel %vm113_vm2, %v109_v0, %v115_v3 }
  0xe1   :  { %v118_v5 = vsel %vm114_vm1, %v111_v2, %v116_v4 }
  0xe2   :  { %222 = vmatprep.mubr.f32.mxu1 %v118_v5 }
  0xe3   :  { %223 = vmatmul.mubr.f32.vlgmr.msra.gmra.mrb[0].mxu1 %v117_v6 }
 0x1b6   :  { %v278_v7 = vpop.f32.mrb[0].mxu1 }
 0x1b7   :  { %v279_v9 = vpop.f32.mrb[1].mxu1 }
 0x1b8   :  { %v280_v10 = vadd.f32 %v279_v9, %v278_v7 }
 0x1ba   :  { %v225_v11 = vadd.f32 %v280_v10, %v245_v8 }
 0x1bc   :  { %229 = vst.msk [vmem:[#allocation2] sm:$0xff] %vm228_vm3, %v225_v11 }
 0x1bd   :  { %330 = shalt.err (!%p327_p4)
}
 0x1be   :  { %s331_s18 = scalar_lea.hbm %s509_s5, 128 }
 0x1bf   :  { %p332_p5 = scmp.ne.s32.totalorder %s509_s5, %s331_s18  ;;  %p335_p6 = scmp.lt.u32.totalorder %s331_s18, %s509_s5 }
 0x1c1   :  { %p337_p7 = pnand %p335_p6, %p332_p5 }
 0x1c3   :  { %340 = shalt.err (!%p337_p7)
}
 0x1c4   :  { %239 = dma.vmem_to_hbm [thread:$0]  %s237_s14, 128, %s509_s5, [#allocation3]  }
 0x1c5   :  { %341 = dma.done.wait [#allocation3], 128  }
 0x1c6   :  { %342 = vsyncadd [#allocation3], 4294967168 }
 0x1c7   :  { %243 = vsyncpa [#allocation3], 1 }

</bundles_post_ra>
